<compile_context>
chip_gen: v7x
topology: tpu7x:2x2x1
jax: 0.10.0
libtpu: 0.0.40
codegen_flags: <defaults>
</compile_context>

<pallas_src>
import jax
import jax.numpy as jnp
from jax.experimental import pallas as pl
from jax.experimental.pallas import tpu as pltpu

_LANE = 128          # vreg lane width
_SUB = 8             # vreg sublane count (f32)
_MAX_BLOCK_BYTES = 4 * 1024 * 1024   # per-block cap: 4 bufs * 4 MiB = 16 MiB << 32 MiB scoped VMEM (v7x-safe)


def _identity_copy_kernel(p_ref, o_ref):
    # Params_module.forward(): return self.p  -> identity copy of the current tile.
    o_ref[...] = p_ref[...]


def _round_up(x: int, m: int) -> int:
    return ((x + m - 1) // m) * m


def _pallas_identity(p: jax.Array) -> jax.Array:
    """Tiled, lane-dense identity copy of an arbitrarily shaped parameter."""
    orig_shape = p.shape
    orig_dtype = p.dtype
    n = int(p.size)
    itemsize = jnp.dtype(orig_dtype).itemsize

    # ---- wrapper-side layout plumbing: flatten to a lane-dense [rows, cols] slab ----
    cols = _LANE
    for c in (4096, 2048, 1024, 512, 256):   # widen lanes for larger params
        if n >= c * _SUB:
            cols = c
            break
    rows = pl.cdiv(n, cols)

    # Row-tile size: multiple of 8, <= 1024 rows, and per-block bytes capped for v7x VMEM.
    max_tr_by_bytes = max(_SUB, (_MAX_BLOCK_BYTES // (cols * itemsize)) // _SUB * _SUB)
    tr = min(1024, max_tr_by_bytes, _round_up(rows, _SUB))

    rows_padded = _round_up(rows, tr)
    total = rows_padded * cols

    flat = p.reshape(-1)
    if total != n:
        flat = jnp.pad(flat, (0, total - n))
    slab = flat.reshape(rows_padded, cols)

    out = pl.pallas_call(
        _identity_copy_kernel,
        out_shape=jax.ShapeDtypeStruct((rows_padded, cols), orig_dtype),
        grid=(rows_padded // tr,),
        in_specs=[pl.BlockSpec((tr, cols), lambda i: (i, 0))],
        out_specs=pl.BlockSpec((tr, cols), lambda i: (i, 0)),
        # Alias the (intermediate) padded slab to the output: no extra HBM allocation.
        input_output_aliases={0: 0},
        compiler_params=pltpu.CompilerParams(
            dimension_semantics=("parallel",),   # v7x: both TensorCores copy half the rows
        ),
    )(slab)

    return out.reshape(-1)[:n].reshape(orig_shape)


# Jit the wrapper so the padded slab is an XLA intermediate (makes the aliasing effective).
params_forward = jax.jit(_pallas_identity)


class ParamsPallas:
    """Mirror of the PyTorch `Params` wrapper.

    # TODO(synk): torch.save/torch.load checkpoint I/O from Proto_Model has no Pallas
    # equivalent and is intentionally omitted.
    """

    def __init__(self, model_name: str, size, key):
        self.model_name = model_name + "_params"
        self.size = tuple(size)
        # nn.init.uniform_(torch.empty(size)) -> U(0, 1); deterministic via `key`.
        self.p = jax.random.uniform(key, self.size, dtype=jnp.float32)

    def forward(self, use_pallas_copy: bool = False) -> jax.Array:
        if use_pallas_copy:
            # Explicit on-chip identity copy (tiled, bandwidth-optimal fallback).
            return params_forward(self.p)
        # Fast path (perf feedback): forward() is `return self.p` -- no copy needed.
        return self.p


if __name__ == "__main__":
    key = jax.random.PRNGKey(0)

    # Small, deliberately non-lane-aligned parameter size to exercise the generic
    # flatten/pad/lane-dense path in the wrapper.
    size = (32, 96)
    model = ParamsPallas("demo", size, key)

    # Zero-copy fast path.
    out_fast = model.forward()
    assert out_fast is model.p

    # Pallas kernel path (run the kernel once and verify exact identity).
    out_kernel = model.forward(use_pallas_copy=True)
    out_kernel = jax.block_until_ready(out_kernel)
    assert out_kernel.shape == size
    assert out_kernel.dtype == jnp.float32
    assert bool(jnp.all(out_kernel == model.p))

    # Extra sanity: ragged size that requires real padding inside the wrapper.
    small = jax.random.uniform(jax.random.PRNGKey(1), (5, 7), dtype=jnp.float32)
    small_out = jax.block_until_ready(params_forward(small))
    assert bool(jnp.all(small_out == small))

    print("KERNEL_OK")
</pallas_src>

<mosaic_0001>
module attributes {stable_mosaic.version = 11 : i64} {
  func.func @_identity_copy_kernel(%arg0: i32, %arg1: memref<16x256xf32, #tpu.memory_space<vmem>>, %arg2: memref<16x256xf32, #tpu.memory_space<vmem>>) attributes {dimension_semantics = [#tpu.dimension_semantics<parallel>], iteration_bounds = array<i64: 1>, scalar_prefetch = 0 : i64, scratch_operands = 0 : i64, tpu.core_type = #tpu.core_type<tc>, window_params = [{transform_indices = @transform_0, window_bounds = array<i64: 16, 256>}, {transform_indices = @transform_1, window_bounds = array<i64: 16, 256>}]} {
    %c0 = arith.constant 0 : index
    %c0_0 = arith.constant 0 : index
    %0 = vector.load %arg1[%c0, %c0_0] : memref<16x256xf32, #tpu.memory_space<vmem>>, vector<16x256xf32>
    %c0_1 = arith.constant 0 : index
    %c0_2 = arith.constant 0 : index
    %1 = vector.load %arg2[%c0_1, %c0_2] : memref<16x256xf32, #tpu.memory_space<vmem>>, vector<16x256xf32>
    tpu.vector_store %arg2[%c0_1, %c0_2], %0 {strides = array<i32>} : memref<16x256xf32, #tpu.memory_space<vmem>>, vector<16x256xf32>,
    return
  }
  func.func @transform_0(%arg0: i32) -> (i32, i32) {
    %c0_i32 = arith.constant 0 : i32
    %c0_i32_0 = arith.constant 0 : i32
    return %arg0, %c0_i32 : i32, i32
  }
  func.func @transform_1(%arg0: i32) -> (i32, i32) {
    %c0_i32 = arith.constant 0 : i32
    %c0_i32_0 = arith.constant 0 : i32
    return %arg0, %c0_i32 : i32, i32
  }
}

</mosaic_0001>

<bundles_post_ra>
// kernel: _pallas_identity.1
= control target key start
LH: loop header
LB: loop body
LE: loop exit
PB: predicated region body
PF: predicated region fallthrough
CT: control target
= control target key end

     0   :  { %s54_s0 = inlined_call_operand.vmem [shape: f32[16,256], index: 0, kind: input, shape index: {}, may-alias: {0,1}]   ;;  %s55_s1 = inlined_call_operand.vmem [shape: f32[16,256], index: 1, kind: output, shape index: {}, may-alias: {0,1}]  }
   0x1   :  { %v8_v0 = vld [vmem:[%s54_s0] sm:$0xff]  ;;  %v9_v1 = vld [vmem:[%s54_s0 + $0x8] sm:$0xff]  ;;  %v10_v2 = vld [vmem:[%s54_s0 + $0x10] sm:$0xff] }
   0x2   :  { %12 = vst [vmem:[%s55_s1] sm:$0xff] %v8_v0  ;;  %13 = vst [vmem:[%s55_s1 + $0x8] sm:$0xff] %v9_v1 }
   0x3   :  { %14 = vst [vmem:[%s55_s1 + $0x10] sm:$0xff] %v10_v2 }
   0xa   :  { %v11_v3 = vld [vmem:[%s54_s0 + $0x18] sm:$0xff] }
   0xb   :  { %15 = vst [vmem:[%s55_s1 + $0x18] sm:$0xff] %v11_v3 }

</bundles_post_ra>
